<compile_context>
chip_gen: v7x
topology: tpu7x:2x2x1
jax: 0.10.0
libtpu: 0.0.40
codegen_flags: <defaults>
</compile_context>

<pallas_src>
import jax
import jax.numpy as jnp
from jax.experimental import pallas as pl
from jax.experimental.pallas import tpu as pltpu


def _round_up(x, m):
    return ((x + m - 1) // m) * m


def dynamics_mlp_kernel(s_ref, a_ref, w1s_ref, w1a_ref, b1_ref,
                        w2_ref, b2_ref, w3_ref, b3_ref, o_ref):
    # Layer 1: Linear(state_dim + action_dim -> hidden) + ReLU, with the
    # [state, action] concat fused as two matmuls against the split weight.
    h1 = (jnp.dot(s_ref[...], w1s_ref[...], preferred_element_type=jnp.float32)
          + jnp.dot(a_ref[...], w1a_ref[...], preferred_element_type=jnp.float32)
          + b1_ref[...])
    h1 = jnp.maximum(h1, 0.0).astype(w2_ref.dtype)

    # Layer 2: Linear(hidden -> hidden) + ReLU
    h2 = jnp.dot(h1, w2_ref[...], preferred_element_type=jnp.float32) + b2_ref[...]
    h2 = jnp.maximum(h2, 0.0).astype(w3_ref.dtype)

    # Layer 3: Linear(hidden -> state_dim + 1), no activation
    out = jnp.dot(h2, w3_ref[...], preferred_element_type=jnp.float32) + b3_ref[...]
    o_ref[...] = out.astype(o_ref.dtype)


def dynamics_model_forward(state, action, params, *, tile_b=1024):
    """Pallas forward pass of DynamicsModel.

    state:  (B, state_dim)  f32
    action: (B, action_dim) f32
    returns (B, state_dim + 1) f32
    """
    w1, b1, w2, b2, w3, b3 = params
    batch, state_dim = state.shape
    action_dim = action.shape[1]
    hidden = w1.shape[1]
    out_dim = w3.shape[1]

    # bf16 weights/activations; f32 accumulation happens inside the kernel.
    w1s = w1[:state_dim].astype(jnp.bfloat16)
    w1a = w1[state_dim:].astype(jnp.bfloat16)
    w2b = w2.astype(jnp.bfloat16)
    w3b = w3.astype(jnp.bfloat16)
    s = state.astype(jnp.bfloat16)
    a = action.astype(jnp.bfloat16)

    # Batch tiling: tile must be a multiple of 8 (sublane); pad B up to a
    # multiple of the tile with zero rows, slice them off at the end.
    tb = min(int(tile_b), _round_up(batch, 8))
    tb = _round_up(tb, 8)
    b_pad = _round_up(batch, tb)
    if b_pad != batch:
        s = jnp.pad(s, ((0, b_pad - batch), (0, 0)))
        a = jnp.pad(a, ((0, b_pad - batch), (0, 0)))
    grid = (b_pad // tb,)

    flops = 2 * b_pad * ((state_dim + action_dim) * hidden
                         + hidden * hidden + hidden * out_dim)
    bytes_accessed = (
        (w1s.size + w1a.size + w2b.size + w3b.size) * 2     # bf16 weights
        + (b1.size + b2.size + b3.size) * 4                  # f32 biases
        + b_pad * (state_dim + action_dim) * 2               # bf16 inputs
        + b_pad * out_dim * 4)                                # f32 output
    cost = pl.CostEstimate(flops=flops, transcendentals=0,
                           bytes_accessed=bytes_accessed)

    out = pl.pallas_call(
        dynamics_mlp_kernel,
        out_shape=jax.ShapeDtypeStruct((b_pad, out_dim), jnp.float32),
        grid=grid,
        in_specs=[
            # Activations: tiled along batch, pipelined.
            pl.BlockSpec((tb, state_dim), lambda i: (i, 0)),
            pl.BlockSpec((tb, action_dim), lambda i: (i, 0)),
            # Weights / biases: full arrays, VMEM-resident across all steps.
            pl.BlockSpec((state_dim, hidden), lambda i: (0, 0)),
            pl.BlockSpec((action_dim, hidden), lambda i: (0, 0)),
            pl.BlockSpec((1, hidden), lambda i: (0, 0)),
            pl.BlockSpec((hidden, hidden), lambda i: (0, 0)),
            pl.BlockSpec((1, hidden), lambda i: (0, 0)),
            pl.BlockSpec((hidden, out_dim), lambda i: (0, 0)),
            pl.BlockSpec((1, out_dim), lambda i: (0, 0)),
        ],
        out_specs=pl.BlockSpec((tb, out_dim), lambda i: (i, 0)),
        compiler_params=pltpu.CompilerParams(
            dimension_semantics=("parallel",)),
        cost_estimate=cost,
    )(s, a, w1s, w1a, b1, w2b, b2, w3b, b3)

    return out[:batch]


def init_params(key, state_dim, action_dim, hidden_dim=64):
    """Deterministic synthetic init (uniform, PyTorch-Linear-like scale)."""
    in_dim = state_dim + action_dim
    out_dim = state_dim + 1
    k = jax.random.split(key, 6)

    def lin(kw, kb, fan_in, fan_out):
        bound = 1.0 / jnp.sqrt(fan_in)
        w = jax.random.uniform(kw, (fan_in, fan_out), jnp.float32, -bound, bound)
        b = jax.random.uniform(kb, (1, fan_out), jnp.float32, -bound, bound)
        return w, b

    w1, b1 = lin(k[0], k[1], in_dim, hidden_dim)
    w2, b2 = lin(k[2], k[3], hidden_dim, hidden_dim)
    w3, b3 = lin(k[4], k[5], hidden_dim, out_dim)
    return (w1, b1, w2, b2, w3, b3)


def reference_forward(state, action, params):
    w1, b1, w2, b2, w3, b3 = params
    x = jnp.concatenate([state, action], axis=-1)
    h1 = jnp.maximum(x @ w1 + b1, 0.0)
    h2 = jnp.maximum(h1 @ w2 + b2, 0.0)
    return h2 @ w3 + b3


if __name__ == "__main__":
    batch = 8
    state_dim = 16
    action_dim = 4
    hidden_dim = 64

    key = jax.random.PRNGKey(0)
    k_state, k_action, k_params = jax.random.split(key, 3)

    state = jax.random.normal(k_state, (batch, state_dim), dtype=jnp.float32)
    action = jax.random.normal(k_action, (batch, action_dim), dtype=jnp.float32)
    params = init_params(k_params, state_dim, action_dim, hidden_dim)

    out = dynamics_model_forward(state, action, params)
    out = jax.block_until_ready(out)

    ref = reference_forward(state, action, params)
    assert out.shape == (batch, state_dim + 1)
    # bf16 weights/activations (f32 accumulation) -> relaxed tolerance vs f32 ref.
    assert jnp.allclose(out, ref, atol=3e-2, rtol=3e-2)

    # Exercise the multi-tile grid + non-divisible-batch padding path.
    batch2 = 20
    state2 = jax.random.normal(jax.random.PRNGKey(1), (batch2, state_dim),
                               dtype=jnp.float32)
    action2 = jax.random.normal(jax.random.PRNGKey(2), (batch2, action_dim),
                                dtype=jnp.float32)
    out2 = dynamics_model_forward(state2, action2, params, tile_b=8)
    out2 = jax.block_until_ready(out2)
    ref2 = reference_forward(state2, action2, params)
    assert out2.shape == (batch2, state_dim + 1)
    assert jnp.allclose(out2, ref2, atol=3e-2, rtol=3e-2)

    print("KERNEL_OK")
</pallas_src>

<mosaic_0001>
module attributes {stable_mosaic.version = 11 : i64} {
  func.func @dynamics_mlp_kernel(%arg0: i32, %arg1: memref<8x16xbf16, #tpu.memory_space<vmem>>, %arg2: memref<8x4xbf16, #tpu.memory_space<vmem>>, %arg3: memref<16x64xbf16, #tpu.memory_space<vmem>>, %arg4: memref<4x64xbf16, #tpu.memory_space<vmem>>, %arg5: memref<1x64xf32, #tpu.memory_space<vmem>>, %arg6: memref<64x64xbf16, #tpu.memory_space<vmem>>, %arg7: memref<1x64xf32, #tpu.memory_space<vmem>>, %arg8: memref<64x17xbf16, #tpu.memory_space<vmem>>, %arg9: memref<1x17xf32, #tpu.memory_space<vmem>>, %arg10: memref<8x17xf32, #tpu.memory_space<vmem>>) attributes {dimension_semantics = [#tpu.dimension_semantics<parallel>], iteration_bounds = array<i64: 1>, scalar_prefetch = 0 : i64, scratch_operands = 0 : i64, tpu.core_type = #tpu.core_type<tc>, window_params = [{transform_indices = @transform_0, window_bounds = array<i64: 8, 16>}, {transform_indices = @transform_1, window_bounds = array<i64: 8, 4>}, {pipeline_mode = #tpu.pipeline_mode<synchronous>, transform_indices = @transform_2, window_bounds = array<i64: 16, 64>}, {pipeline_mode = #tpu.pipeline_mode<synchronous>, transform_indices = @transform_3, window_bounds = array<i64: 4, 64>}, {pipeline_mode = #tpu.pipeline_mode<synchronous>, transform_indices = @transform_4, window_bounds = array<i64: 1, 64>}, {pipeline_mode = #tpu.pipeline_mode<synchronous>, transform_indices = @transform_5, window_bounds = array<i64: 64, 64>}, {pipeline_mode = #tpu.pipeline_mode<synchronous>, transform_indices = @transform_6, window_bounds = array<i64: 1, 64>}, {pipeline_mode = #tpu.pipeline_mode<synchronous>, transform_indices = @transform_7, window_bounds = array<i64: 64, 17>}, {pipeline_mode = #tpu.pipeline_mode<synchronous>, transform_indices = @transform_8, window_bounds = array<i64: 1, 17>}, {transform_indices = @transform_9, window_bounds = array<i64: 8, 17>}]} {
    %c0 = arith.constant 0 : index
    %c0_0 = arith.constant 0 : index
    %0 = vector.load %arg1[%c0, %c0_0] : memref<8x16xbf16, #tpu.memory_space<vmem>>, vector<8x16xbf16>
    %c0_1 = arith.constant 0 : index
    %c0_2 = arith.constant 0 : index
    %1 = vector.load %arg3[%c0_1, %c0_2] : memref<16x64xbf16, #tpu.memory_space<vmem>>, vector<16x64xbf16>
    %cst = arith.constant dense<0.000000e+00> : vector<8x64xf32>
    %2 = tpu.matmul %0, %1, %cst {dimension_numbers = #tpu.dot_dimension_numbers<[1], [0], [0], [1], [0, 0, 1, 1], [], []>} : vector<8x16xbf16>, vector<16x64xbf16>, vector<8x64xf32> -> vector<8x64xf32>
    %c0_3 = arith.constant 0 : index
    %c0_4 = arith.constant 0 : index
    %3 = vector.load %arg2[%c0_3, %c0_4] : memref<8x4xbf16, #tpu.memory_space<vmem>>, vector<8x4xbf16>
    %c0_5 = arith.constant 0 : index
    %c0_6 = arith.constant 0 : index
    %4 = vector.load %arg4[%c0_5, %c0_6] : memref<4x64xbf16, #tpu.memory_space<vmem>>, vector<4x64xbf16>
    %cst_7 = arith.constant dense<0.000000e+00> : vector<8x64xf32>
    %5 = tpu.matmul %3, %4, %cst_7 {dimension_numbers = #tpu.dot_dimension_numbers<[1], [0], [0], [1], [0, 0, 1, 1], [], []>} : vector<8x4xbf16>, vector<4x64xbf16>, vector<8x64xf32> -> vector<8x64xf32>
    %6 = arith.addf %2, %5 : vector<8x64xf32>
    %c0_8 = arith.constant 0 : index
    %c0_9 = arith.constant 0 : index
    %7 = vector.load %arg5[%c0_8, %c0_9] : memref<1x64xf32, #tpu.memory_space<vmem>>, vector<1x64xf32>
    %8 = vector.broadcast %7 : vector<1x64xf32> to vector<8x64xf32>
    %9 = arith.addf %6, %8 : vector<8x64xf32>
    %cst_10 = arith.constant 0.000000e+00 : f32
    %10 = vector.broadcast %cst_10 : f32 to vector<8x64xf32>
    %11 = arith.maximumf %9, %10 : vector<8x64xf32>
    %12 = arith.truncf %11 : vector<8x64xf32> to vector<8x64xbf16>
    %c0_11 = arith.constant 0 : index
    %c0_12 = arith.constant 0 : index
    %13 = vector.load %arg6[%c0_11, %c0_12] : memref<64x64xbf16, #tpu.memory_space<vmem>>, vector<64x64xbf16>
    %cst_13 = arith.constant dense<0.000000e+00> : vector<8x64xf32>
    %14 = tpu.matmul %12, %13, %cst_13 {dimension_numbers = #tpu.dot_dimension_numbers<[1], [0], [0], [1], [0, 0, 1, 1], [], []>} : vector<8x64xbf16>, vector<64x64xbf16>, vector<8x64xf32> -> vector<8x64xf32>
    %c0_14 = arith.constant 0 : index
    %c0_15 = arith.constant 0 : index
    %15 = vector.load %arg7[%c0_14, %c0_15] : memref<1x64xf32, #tpu.memory_space<vmem>>, vector<1x64xf32>
    %16 = vector.broadcast %15 : vector<1x64xf32> to vector<8x64xf32>
    %17 = arith.addf %14, %16 : vector<8x64xf32>
    %cst_16 = arith.constant 0.000000e+00 : f32
    %18 = vector.broadcast %cst_16 : f32 to vector<8x64xf32>
    %19 = arith.maximumf %17, %18 : vector<8x64xf32>
    %20 = arith.truncf %19 : vector<8x64xf32> to vector<8x64xbf16>
    %c0_17 = arith.constant 0 : index
    %c0_18 = arith.constant 0 : index
    %21 = vector.load %arg8[%c0_17, %c0_18] : memref<64x17xbf16, #tpu.memory_space<vmem>>, vector<64x17xbf16>
    %cst_19 = arith.constant dense<0.000000e+00> : vector<8x17xf32>
    %22 = tpu.matmul %20, %21, %cst_19 {dimension_numbers = #tpu.dot_dimension_numbers<[1], [0], [0], [1], [0, 0, 1, 1], [], []>} : vector<8x64xbf16>, vector<64x17xbf16>, vector<8x17xf32> -> vector<8x17xf32>
    %c0_20 = arith.constant 0 : index
    %c0_21 = arith.constant 0 : index
    %23 = vector.load %arg9[%c0_20, %c0_21] : memref<1x17xf32, #tpu.memory_space<vmem>>, vector<1x17xf32>
    %24 = vector.broadcast %23 : vector<1x17xf32> to vector<8x17xf32>
    %25 = arith.addf %22, %24 : vector<8x17xf32>
    %c0_22 = arith.constant 0 : index
    %c0_23 = arith.constant 0 : index
    %26 = vector.load %arg10[%c0_22, %c0_23] : memref<8x17xf32, #tpu.memory_space<vmem>>, vector<8x17xf32>
    tpu.vector_store %arg10[%c0_22, %c0_23], %25 {strides = array<i32>} : memref<8x17xf32, #tpu.memory_space<vmem>>, vector<8x17xf32>,
    return
  }
  func.func @transform_0(%arg0: i32) -> (i32, i32) {
    %c0_i32 = arith.constant 0 : i32
    %c0_i32_0 = arith.constant 0 : i32
    return %arg0, %c0_i32 : i32, i32
  }
  func.func @transform_1(%arg0: i32) -> (i32, i32) {
    %c0_i32 = arith.constant 0 : i32
    %c0_i32_0 = arith.constant 0 : i32
    return %arg0, %c0_i32 : i32, i32
  }
  func.func @transform_2(%arg0: i32) -> (i32, i32) {
    %c0_i32 = arith.constant 0 : i32
    %c0_i32_0 = arith.constant 0 : i32
    %c0_i32_1 = arith.constant 0 : i32
    return %c0_i32, %c0_i32_0 : i32, i32
  }
  func.func @transform_3(%arg0: i32) -> (i32, i32) {
    %c0_i32 = arith.constant 0 : i32
    %c0_i32_0 = arith.constant 0 : i32
    %c0_i32_1 = arith.constant 0 : i32
    return %c0_i32, %c0_i32_0 : i32, i32
  }
  func.func @transform_4(%arg0: i32) -> (i32, i32) {
    %c0_i32 = arith.constant 0 : i32
    %c0_i32_0 = arith.constant 0 : i32
    %c0_i32_1 = arith.constant 0 : i32
    return %c0_i32, %c0_i32_0 : i32, i32
  }
  func.func @transform_5(%arg0: i32) -> (i32, i32) {
    %c0_i32 = arith.constant 0 : i32
    %c0_i32_0 = arith.constant 0 : i32
    %c0_i32_1 = arith.constant 0 : i32
    return %c0_i32, %c0_i32_0 : i32, i32
  }
  func.func @transform_6(%arg0: i32) -> (i32, i32) {
    %c0_i32 = arith.constant 0 : i32
    %c0_i32_0 = arith.constant 0 : i32
    %c0_i32_1 = arith.constant 0 : i32
    return %c0_i32, %c0_i32_0 : i32, i32
  }
  func.func @transform_7(%arg0: i32) -> (i32, i32) {
    %c0_i32 = arith.constant 0 : i32
    %c0_i32_0 = arith.constant 0 : i32
    %c0_i32_1 = arith.constant 0 : i32
    return %c0_i32, %c0_i32_0 : i32, i32
  }
  func.func @transform_8(%arg0: i32) -> (i32, i32) {
    %c0_i32 = arith.constant 0 : i32
    %c0_i32_0 = arith.constant 0 : i32
    %c0_i32_1 = arith.constant 0 : i32
    return %c0_i32, %c0_i32_0 : i32, i32
  }
  func.func @transform_9(%arg0: i32) -> (i32, i32) {
    %c0_i32 = arith.constant 0 : i32
    %c0_i32_0 = arith.constant 0 : i32
    return %arg0, %c0_i32 : i32, i32
  }
}

</mosaic_0001>

<bundles_post_ra>
// kernel: tpu_custom_call.1
= control target key start
LH: loop header
LB: loop body
LE: loop exit
PB: predicated region body
PF: predicated region fallthrough
CT: control target
= control target key end

     0   :  { %vm43_vm0 = vcmask 1041408   ;;  %v432_v1 = vmov 0.0   ;;  %vm39_vm1 = vcmask 31744   ;;  %vm433_vm2 = vmmov 0   ;;  %s548_s0 = inlined_call_operand.vmem [shape: bf16[8,16], index: 0, kind: input, shape index: {}]   ;;  %s549_s1 = inlined_call_operand.vmem [shape: bf16[8,4], index: 1, kind: input, shape index: {}]   ;;  %s550_s2 = inlined_call_operand.vmem [shape: bf16[16,64], index: 2, kind: input, shape index: {}]   ;;  %s551_s3 = inlined_call_operand.vmem [shape: bf16[4,64], index: 3, kind: input, shape index: {}]   ;;  %s552_s4 = inlined_call_operand.vmem [shape: f32[1,64], index: 4, kind: input, shape index: {}]   ;;  %s553_s5 = inlined_call_operand.vmem [shape: bf16[64,64], index: 5, kind: input, shape index: {}]   ;;  %s554_s6 = inlined_call_operand.vmem [shape: f32[1,64], index: 6, kind: input, shape index: {}]   ;;  %s555_s7 = inlined_call_operand.vmem [shape: bf16[64,17], index: 7, kind: input, shape index: {}]   ;;  %s556_s8 = inlined_call_operand.vmem [shape: f32[1,17], index: 8, kind: input, shape index: {}]   ;;  %s557_s9 = inlined_call_operand.hbm [shape: f32[8,17], index: 9, kind: output, shape index: {}]  }
   0x1   :  { %v38_v0 = vld [vmem:[%s551_s3] sm:$0x3]  ;;  %360 = vmatprep.subr.bf16.mxu0 %v432_v1  ;;  %366 = vmatprep.subr.bf16.mxu1 %v432_v1  ;;  %vm93_vm3 = vcmask 130048   ;;  %v401_v7 = vld [vmem:[%s553_s5 + $0x8] sm:$0xff]  }
   0x2   :  { %v45_v2 = vsel %vm43_vm0, %v38_v0, 0  ;;  %v399_v3 = vld [vmem:[%s550_s2] sm:$0xff]   ;;  %362 = vmatprep.mubr.msk.bf16.mxu0 %vm433_vm2, %v432_v1  ;;  %368 = vmatprep.mubr.msk.bf16.mxu1 %vm433_vm2, %v432_v1 }
   0x3   :  { %361 = vmatpush3.bf16.msra.mxu0 %v45_v2  ;;  %v37_v4 = vld [vmem:[%s549_s1] sm:$0xf]  ;;  %367 = vmatpush3.bf16.msra.mxu1 %v399_v3 }
   0x4   :  { %v34_v5 = vld [vmem:[%s548_s0] sm:$0xf]  ;;  %372 = vmatprep.subr.bf16.mxu0 %v432_v1  ;;  %384 = vmatprep.subr.bf16.mxu1 %v432_v1 }
   0x5   :  { %v400_v6 = vld [vmem:[%s553_s5] sm:$0xff]  }
   0x6   :  { %363 = vmatmul.mubr.msk.bf16.vlgmr.msra.gmra.mrb[0].mxu0 %vm39_vm1, %v37_v4  ;;  %369 = vmatmul.mubr.msk.bf16.vlgmr.msra.gmra.mrb[0].mxu1 %vm93_vm3, %v34_v5 }
   0x7   :  { %373 = vmatpush3.bf16.msra.mxu0 %v400_v6  ;;  %380 = vmatprep.mubr.msk.bf16.mxu0 %vm433_vm2, %v432_v1 }
   0x8   :  { %374 = vmatprep.subr.bf16.mxu0 %v432_v1  ;;  %392 = vmatprep.mubr.msk.bf16.mxu1 %vm433_vm2, %v432_v1 }
   0x9   :  { %14 = vsyncpa [#allocation3], 0  ;;  %v402_v8 = vld [vmem:[%s553_s5 + $0x10] sm:$0xff]   ;;  %v403_v9 = vld [vmem:[%s553_s5 + $0x18] sm:$0xff]   ;;  %vm186_vm4 = vcmask 523264   ;;  %s434_s12 = smov [#allocation2]  }
   0xa   :  { %v404_v10 = vld [vmem:[%s555_s7] sm:$0xff]   ;;  %v405_v11 = vld [vmem:[%s555_s7 + $0x8] sm:$0xff]   ;;  %v406_v25 = vld [vmem:[%s555_s7 + $0x10] sm:$0xff]   ;;  %vm314_vm5 = vcmask 138240  }
   0xb   :  { %375 = vmatpush3.bf16.msra.mxu0 %v401_v7  ;;  %385 = vmatpush3.bf16.msra.mxu1 %v404_v10  ;;  %v333_v15 = vld [vmem:[%s552_s4] ss:$0 sm:$0xff]  ;;  %v407_v26 = vld [vmem:[%s555_s7 + $0x18] sm:$0xff]   ;;  %s322_s7 = sshll.u32 %s434_s12, 4  ;;  %s323_s7 = int_to_ptr.vmem [resolvable:$true] %s322_s7 }
   0xc   :  { %376 = vmatprep.subr.bf16.mxu0 %v432_v1  ;;  %386 = vmatprep.subr.bf16.mxu1 %v432_v1  ;;  %v334_v27 = vld [vmem:[%s554_s6] ss:$0 sm:$0xff]  ;;  %s408_s6 = scalar_lea.vmem %s323_s7, 128  ;;  %p413_p1 = scmp.lt.s32.totalorder %s323_s7, %s323_s7 }
   0xd   :  { %v340_v35 = vld [vmem:[%s556_s8] ss:$0 sm:$0xff]  ;;  %p409_p0 = scmp.ne.s32.totalorder %s323_s7, %s408_s6  ;;  %p414_p2 = scmp.lt.s32.totalorder %s408_s6, %s408_s6 }
   0xf   :  { %377 = vmatpush3.bf16.msra.mxu0 %v402_v8  ;;  %387 = vmatpush3.bf16.msra.mxu1 %v405_v11  ;;  %p415_p3 = por %p414_p2, %p413_p1 }
  0x10   :  { %378 = vmatprep.subr.bf16.mxu0 %v432_v1  ;;  %388 = vmatprep.subr.bf16.mxu1 %v432_v1 }
  0x11   :  { %p416_p4 = pnand %p415_p3, %p409_p0 }
  0x13   :  { %379 = vmatpush3.bf16.msra.mxu0 %v403_v9  ;;  %389 = vmatpush3.bf16.msra.mxu1 %v406_v25 }
  0x14   :  { %390 = vmatprep.subr.bf16.mxu1 %v432_v1 }
  0x17   :  { %391 = vmatpush3.bf16.msra.mxu1 %v407_v26 }
  0xd9   :  { %v81_v12 = vpop.f32.mrb[0].mxu0  ;;  %v131_v14 = vpop.f32.mrb[0].mxu1 }
  0xda   :  { %v364_v13 = vpop.f32.mrb[1].mxu0  ;;  %v132_v16 = vadd.f32 %v131_v14, %v81_v12  ;;  %v370_v18 = vpop.f32.mrb[1].mxu1 }
  0xdb   :  { %v84_v17 = vpop.f32.mrb[2].mxu0  ;;  %v134_v20 = vpop.f32.mrb[2].mxu1 }
  0xdc   :  { %v365_v19 = vpop.f32.mrb[3].mxu0  ;;  %v144_v21 = vadd.f32 %v333_v15, %v132_v16  ;;  %v371_v22 = vpop.f32.mrb[3].mxu1 }
  0xde   :  { %v145_v23 = vmax.f32 %v144_v21, 0.0 }
  0xe0   :  { %v146_v24 = vpack.c.bf16 %v145_v23, %v145_v23 }
  0xe2   :  { %381 = vmatmul.mubr.msk.bf16.vlgmr.msra.gmra.mrb[4].mxu0 %vm186_vm4, %v146_v24 }
 0x1b5   :  { %v224_v28 = vpop.f32.mrb[4].mxu0 }
 0x1b6   :  { %v225_v29 = vadd.f32 %v334_v27, %v224_v28  ;;  %v382_v30 = vpop.f32.mrb[5].mxu0 }
 0x1b7   :  { %v227_v31 = vpop.f32.mrb[6].mxu0 }
 0x1b8   :  { %v230_v32 = vmax.f32 %v225_v29, 0.0  ;;  %v383_v33 = vpop.f32.mrb[7].mxu0 }
 0x1ba   :  { %v231_v34 = vpack.c.bf16 %v230_v32, %v230_v32 }
 0x1bc   :  { %393 = vmatmul.mubr.msk.bf16.vlgmr.msra.gmra.mrb[4].mxu1 %vm186_vm4, %v231_v34 }
 0x28f   :  { %v308_v36 = vpop.f32.mrb[4].mxu1 }
 0x290   :  { %v309_v37 = vadd.f32 %v340_v35, %v308_v36  ;;  %v394_v38 = vpop.f32.mrb[5].mxu1 }
 0x291   :  { %v311_v39 = vpop.f32.mrb[6].mxu1 }
 0x292   :  { %v395_v40 = vpop.f32.mrb[7].mxu1  ;;  %315 = vst.msk [vmem:[#allocation2] sm:$0xff] %vm314_vm5, %v309_v37 }
 0x293   :  { %419 = shalt.err (!%p416_p4)
}
 0x294   :  { %s420_s8 = scalar_lea.hbm %s557_s9, 128 }
 0x295   :  { %p421_p5 = scmp.ne.s32.totalorder %s557_s9, %s420_s8  ;;  %p424_p6 = scmp.lt.u32.totalorder %s420_s8, %s557_s9 }
 0x297   :  { %p426_p7 = pnand %p424_p6, %p421_p5 }
 0x299   :  { %429 = shalt.err (!%p426_p7)
}
 0x29a   :  { %325 = dma.vmem_to_hbm [thread:$0]  %s323_s7, 128, %s557_s9, [#allocation3]  }
 0x29b   :  { %430 = dma.done.wait [#allocation3], 128  }
 0x29c   :  { %431 = vsyncadd [#allocation3], 4294967168 }
 0x29d   :  { %329 = vsyncpa [#allocation3], 1 }

</bundles_post_ra>
